<compile_context>
chip_gen: v5e
topology: v5e:2x2
jax: 0.10.0
libtpu: 0.0.40
codegen_flags: <defaults>
</compile_context>

<pallas_src>
import jax
import jax.numpy as jnp
from jax.experimental import pallas as pl
from jax.experimental.pallas import tpu as pltpu


def _block_kernel(x_ref, x_last_ref, o_ref):
    # All refs are (TB, D) VMEM tiles with identical layout -> pure VPU
    # lockstep add/mul/max.  Weak-typed literals keep bf16 inputs in bf16.
    o_ref[...] = jnp.maximum((x_ref[...] + 1) * x_last_ref[...], 0)


def _vmem_budgets():
    """Generation-aware budget for resident tiles plus an explicit scoped-VMEM
    limit (v5e default scoped limit is 16 MiB; v7x physical VMEM is 64 MiB)."""
    try:
        cap = int(pltpu.get_tpu_info().vmem_capacity_bytes)
    except Exception:  # pragma: no cover - conservative default (v7x per-TC)
        cap = 64 << 20
    tile_budget = min(cap // 2, 48 << 20)       # 3 arrays x 2 pipeline buffers
    vmem_limit = min(cap, tile_budget + (16 << 20))
    return tile_budget, vmem_limit


def _choose_batch_tile(B, D, itemsize, tile_budget):
    """Largest 8-aligned batch tile whose 6-buffer working set (2 inputs + 1
    output, double-buffered) fits the budget.  Prefers >=2 grid steps (so
    v7x's two TensorCores both stream) and a tile that divides B exactly."""
    bytes_per_row = 6 * max(1, D * itemsize)
    max_rows = max(8, (tile_budget // bytes_per_row) // 8 * 8)
    tb = min(8192, max_rows)

    if tb >= B:
        if B >= 16:
            # Split into >=2 steps so the "parallel" axis can shard across
            # v7x's two TensorCores (harmless on single-TC v5e/v6e).
            half = (-(-B // 2) + 7) // 8 * 8
            return min(half, B)
        return B  # full-extent block: always layout-legal

    # Prefer an 8-aligned tile near the max that divides B (no partial block).
    t = tb
    while t >= max(8, tb // 2):
        if B % t == 0:
            return t
        t -= 8
    return tb


def block_forward(x, x_input, *, small_bytes_fallback=0):
    """relu((1 + x) * x_input[:, -1, :]) via a Pallas TPU kernel.

    x: (B, D), x_input: (B, S, D) -> (B, D)
    """
    B, D = x.shape
    Bi, S, Di = x_input.shape
    assert B == Bi and D == Di, "x and x_input must agree on (B, D)"

    itemsize = jnp.dtype(x.dtype).itemsize

    # Optional tiny-input bypass: fixed pallas_call overhead dwarfs a few KiB
    # of useful work; a fused XLA elementwise op wins there.  Disabled by
    # default so callers opt in explicitly.
    if 3 * B * D * itemsize <= small_bytes_fallback:
        return jnp.maximum((1 + x) * x_input[:, -1, :], 0)

    tile_budget, vmem_limit = _vmem_budgets()
    TB = _choose_batch_tile(B, D, itemsize, tile_budget)
    grid = (pl.cdiv(B, TB),)

    cost = pl.CostEstimate(flops=3 * B * D, transcendentals=0,
                           bytes_accessed=3 * B * D * itemsize)
    cparams = pltpu.CompilerParams(dimension_semantics=("parallel",),
                                   vmem_limit_bytes=vmem_limit)
    out_shape = jax.ShapeDtypeStruct((B, D), x.dtype)

    if D % 128 == 0:
        # Fast path: collapse (B, S, D) -> (B, S*D) (free reshape) and fetch
        # the last-timestep window directly via the BlockSpec DMA at column
        # block index S-1 (element offset (S-1)*D).  Blocks are (TB, D) with
        # D a multiple of 128 and TB 8-aligned (or == B), so the layout
        # constraint holds and the DMA is a clean strided copy.
        x_in_2d = x_input.reshape(B, S * D)
        return pl.pallas_call(
            _block_kernel,
            out_shape=out_shape,
            grid_spec=pltpu.PrefetchScalarGridSpec(
                num_scalar_prefetch=0,
                grid=grid,
                in_specs=[
                    pl.BlockSpec((TB, D), lambda i: (i, 0)),
                    pl.BlockSpec((TB, D), lambda i: (i, S - 1)),
                ],
                out_specs=pl.BlockSpec((TB, D), lambda i: (i, 0)),
            ),
            compiler_params=cparams,
            cost_estimate=cost,
        )(x, x_in_2d)

    # Fallback (D not lane-aligned): slice the last timestep in the wrapper
    # (one extra B*D HBM round trip) and use full-extent-D blocks, which are
    # layout-legal for any D.
    x_last = x_input[:, -1, :]
    return pl.pallas_call(
        _block_kernel,
        out_shape=out_shape,
        grid_spec=pltpu.PrefetchScalarGridSpec(
            num_scalar_prefetch=0,
            grid=grid,
            in_specs=[
                pl.BlockSpec((TB, D), lambda i: (i, 0)),
                pl.BlockSpec((TB, D), lambda i: (i, 0)),
            ],
            out_specs=pl.BlockSpec((TB, D), lambda i: (i, 0)),
        ),
        compiler_params=cparams,
        cost_estimate=cost,
    )(x, x_last)


def block_reference(x, x_input):
    # Pure-JAX reference matching the PyTorch forward.
    return jnp.maximum((1 + x) * x_input[:, -1, :], 0)


if __name__ == "__main__":
    key = jax.random.PRNGKey(0)
    k1, k2, k3, k4 = jax.random.split(key, 4)

    # Shape 1: even 2-step grid (exercises the megacore-friendly batch split
    # and the in-BlockSpec last-timestep slice).
    B, S, D = 16, 8, 128
    x = jax.random.normal(k1, (B, D), dtype=jnp.float32)
    x_input = jax.random.normal(k2, (B, S, D), dtype=jnp.float32)
    out = jax.block_until_ready(block_forward(x, x_input))
    ref = block_reference(x, x_input)
    assert out.shape == (B, D)
    assert jnp.allclose(out, ref, atol=1e-6, rtol=1e-6)

    # Shape 2: trailing partial batch block (masked writes) + wider D.
    B2, S2, D2 = 20, 3, 256
    x2 = jax.random.normal(k3, (B2, D2), dtype=jnp.float32)
    x_input2 = jax.random.normal(k4, (B2, S2, D2), dtype=jnp.float32)
    out2 = jax.block_until_ready(block_forward(x2, x_input2))
    ref2 = block_reference(x2, x_input2)
    assert out2.shape == (B2, D2)
    assert jnp.allclose(out2, ref2, atol=1e-6, rtol=1e-6)

    print("KERNEL_OK")
</pallas_src>

<mosaic_0001>
module attributes {stable_mosaic.version = 11 : i64} {
  func.func @_block_kernel(%arg0: i32, %arg1: memref<8x128xf32, #tpu.memory_space<vmem>>, %arg2: memref<8x128xf32, #tpu.memory_space<vmem>>, %arg3: memref<8x128xf32, #tpu.memory_space<vmem>>) attributes {dimension_semantics = [#tpu.dimension_semantics<parallel>], iteration_bounds = array<i64: 2>, scalar_prefetch = 0 : i64, scratch_operands = 0 : i64, tpu.core_type = #tpu.core_type<tc>, window_params = [{transform_indices = @transform_0, window_bounds = array<i64: 8, 128>}, {transform_indices = @transform_1, window_bounds = array<i64: 8, 128>}, {transform_indices = @transform_2, window_bounds = array<i64: 8, 128>}]} {
    %c0 = arith.constant 0 : index
    %c0_0 = arith.constant 0 : index
    %0 = vector.load %arg1[%c0, %c0_0] : memref<8x128xf32, #tpu.memory_space<vmem>>, vector<8x128xf32>
    %cst = arith.constant 1.000000e+00 : f32
    %1 = vector.broadcast %cst : f32 to vector<8x128xf32>
    %2 = arith.addf %0, %1 : vector<8x128xf32>
    %c0_1 = arith.constant 0 : index
    %c0_2 = arith.constant 0 : index
    %3 = vector.load %arg2[%c0_1, %c0_2] : memref<8x128xf32, #tpu.memory_space<vmem>>, vector<8x128xf32>
    %4 = arith.mulf %2, %3 : vector<8x128xf32>
    %cst_3 = arith.constant 0.000000e+00 : f32
    %5 = vector.broadcast %cst_3 : f32 to vector<8x128xf32>
    %6 = arith.maximumf %4, %5 : vector<8x128xf32>
    %c0_4 = arith.constant 0 : index
    %c0_5 = arith.constant 0 : index
    %7 = vector.load %arg3[%c0_4, %c0_5] : memref<8x128xf32, #tpu.memory_space<vmem>>, vector<8x128xf32>
    tpu.vector_store %arg3[%c0_4, %c0_5], %6 {strides = array<i32>} : memref<8x128xf32, #tpu.memory_space<vmem>>, vector<8x128xf32>,
    return
  }
  func.func @transform_0(%arg0: i32) -> (i32, i32) {
    %c0_i32 = arith.constant 0 : i32
    %c0_i32_0 = arith.constant 0 : i32
    return %arg0, %c0_i32 : i32, i32
  }
  func.func @transform_1(%arg0: i32) -> (i32, i32) {
    %c7_i32 = arith.constant 7 : i32
    %c0_i32 = arith.constant 0 : i32
    return %arg0, %c7_i32 : i32, i32
  }
  func.func @transform_2(%arg0: i32) -> (i32, i32) {
    %c0_i32 = arith.constant 0 : i32
    %c0_i32_0 = arith.constant 0 : i32
    return %arg0, %c0_i32 : i32, i32
  }
}

</mosaic_0001>

<bundles_post_ra>
// kernel: tpu_custom_call.1
= control target key start
LH: loop header
LB: loop body
LE: loop exit
PB: predicated region body
PF: predicated region fallthrough
CT: control target
= control target key end

     0   :  { %7 = vsyncpa [#allocation3], 0  ;;  %s695_s0 = inlined_call_operand.hbm [shape: f32[16,128], index: 0, kind: input, shape index: {}]   ;;  %s696_s1 = inlined_call_operand.hbm [shape: f32[16,1024], index: 1, kind: input, shape index: {}]   ;;  %s697_s2 = inlined_call_operand.hbm [shape: f32[16,128], index: 2, kind: output, shape index: {}]  }
   0x1   :  { %9 = vsyncpa [#allocation3 + $0x1], 0 }
   0x2   :  { %10 = vsyncpa [#allocation6], 0 }
   0x3   :  { %12 = vsyncpa [#allocation6 + $0x1], 0 }
   0x4   :  { %13 = vsyncpa [#allocation4], 0 }
   0x5   :  { %15 = vsyncpa [#allocation4 + $0x1], 0  ;;  %s534_s9 = smov 0   ;;  %s536_s10 = smov 0  }
   0x6   :  { %s538_s11 = smov 0   ;;  %s540_s12 = smov 0  }
   0x7 LB: > { %s555_s13 = sadd.s32 4294967295, %s517_s12   ;;  %s319_s14 = sadd.s32 4294967294, %s517_s12   ;;  %s517_s12 = sphi %s540_s12, %s708_s12   ;;  %s513_s11 = sphi %s538_s11, %s707_s11   ;;  %s509_s10 = sphi %s536_s10, %s706_s10   ;;  %s505_s9 = sphi %s534_s9, %s705_s9  }
   0x8   : > { %s559_s15 = sadd.s32 1, %s517_s12   ;;  %s28_s16 = sadd.s32 1, %s513_s11 }
   0x9   : > { %s25_s17 = ssub.s32 %s517_s12, %s559_s15  ;;  %p35_p0 = scmp.ne.s32.totalorder %s513_s11, %s509_s10 }
   0xa   : > { %p26_p1 = scmp.eq.s32.totalorder %s25_s17, 0  ;;  %p36_p2 = scmp.eq.s32.totalorder %s517_s12, 0 }
   0xb   : > { %p41_p3 = scmp.ne.s32.totalorder %s509_s10, %s505_s9  ;;  %p42_p4 = scmp.eq.s32.totalorder %s555_s13, 0 }
   0xc   : > { %s571_s18 = scalar_select %p26_p1, %s513_s11, %s28_s16  }
   0xd   : > { %p573_p5 = por %p36_p2, %p35_p0  ;;  %p577_p6 = por %p42_p4, %p41_p3 }
   0xe   : > { %p91_p7 = scmp.eq.s32.totalorder %s555_s13, 1  ;;  %p97_p8 = scmp.eq.s32.totalorder %s319_s14, 1 }
   0xf   : > { %p353_p10 = scmp.lt.s32.totalorder %s517_s12, 2  ;;  %s593_s23 = sand.u32 1, %s513_s11  }
  0x10   : > { %p584_p11 = por %p91_p7, %p35_p0  ;;  %p588_p12 = por %p97_p8, %p41_p3 }
  0x11   : > { %s323_s24 = sshll.u32 %s517_s12, 3  ;;  %s322_s25 = sshll.u32 %s593_s23, 3 }
  0x12   : > { %s125_s28 = scalar_lea.hbm %s695_s0, %s323_s24  ;;  %s121_s30 = scalar_lea.vmem [#allocation2], %s322_s25 }
  0x13   : > { %s127_s29 = sshll.u32 %s125_s28, 4  ;;  %s129_s3 = sshll.u32 %s121_s30, 4  ;;  %s128_s29 = int_to_ptr.hbm [resolvable:$true] %s127_s29  ;;  %s130_s3 = int_to_ptr.vmem [resolvable:$true] %s129_s3 }
  0x14   : > { %p602_p13 = pnand %p353_p10, %p573_p5  ;;  %p327_p0 = scmp.ge.s32.totalorder %s517_s12, 1 }
  0x15   : > { %p155_p1 = scmp.lt.s32.totalorder %s517_s12, 3  ;;  %s118_s5 = scalar_lea.sflag [#allocation3], %s593_s23 }
  0x16   : > { %s387_s6 = sshra.s32 %s128_s29, 4  ;;  %p391_p3 = pneg %p602_p13  ;;  %s388_s6 = int_to_ptr.hbm [resolvable:$true] %s387_s6 }
  0x17   : > { %s389_s7 = scalar_lea.hbm %s388_s6, 8  ;;  %s394_s16 = scalar_lea.hbm %s695_s0, 16 }
  0x18   : > { %p390_p2 = scmp.ne.s32.totalorder %s388_s6, %s389_s7  ;;  %p395_p5 = scmp.lt.s32.totalorder %s388_s6, %s695_s0 }
  0x19   : > { %p396_p8 = scmp.lt.s32.totalorder %s394_s16, %s389_s7 }
  0x1a   : > { %p392_p4 = pnand %p391_p3, %p390_p2 }
  0x1b   : > { %p397_p10 = por %p396_p8, %p395_p5 }
  0x1c   : > { %p393_p7 = pneg %p392_p4 }
  0x1e   : > { %p398_p9 = pnand %p397_p10, %p393_p7 }
  0x20   : > { %401 = shalt.err (!%p398_p9)
}
  0x21   : > { %345 = dma.hbm_to_vmem [thread:$0]  (!%p602_p13), %s128_s29, 128, %s130_s3, %s118_s5  }
  0x22   : > { %p626_p2 = pnand %p327_p0, %p155_p1  ;;  %s335_s26 = sshll.u32 %s517_s12, 6 }
  0x23   : > { %s261_s30 = scalar_lea.hbm %s696_s1, %s335_s26  ;;  %s140_s6 = scalar_lea.vmem [#allocation5], %s322_s25 }
  0x24   : > { %s150_s7 = sshll.u32 %s140_s6, 4  ;;  %s262_s8 = scalar_lea.hbm %s261_s30, 56  ;;  %s151_s7 = int_to_ptr.vmem [resolvable:$true] %s150_s7 }
  0x25   : > { %s148_s14 = sshll.u32 %s262_s8, 4  ;;  %s137_s16 = scalar_lea.sflag [#allocation6], %s593_s23  ;;  %s149_s14 = int_to_ptr.hbm [resolvable:$true] %s148_s14 }
  0x26   : > { %s417_s17 = sshra.s32 %s149_s14, 4  ;;  %s424_s19 = scalar_lea.hbm %s696_s1, 128  ;;  %s418_s17 = int_to_ptr.hbm [resolvable:$true] %s417_s17 }
  0x27   : > { %s419_s29 = scalar_lea.hbm %s418_s17, 8  ;;  %p425_p4 = scmp.lt.s32.totalorder %s418_s17, %s696_s1 }
  0x28   : > { %p420_p9 = scmp.ne.s32.totalorder %s418_s17, %s419_s29  ;;  %p426_p7 = scmp.lt.s32.totalorder %s424_s19, %s419_s29 }
  0x2a   : > { %p422_p0 = pnand %p420_p9, %p391_p3  ;;  %p427_p5 = por %p426_p7, %p425_p4 }
  0x2c   : > { %p423_p1 = pneg %p422_p0 }
  0x2e   : > { %p428_p8 = pnand %p427_p5, %p423_p1 }
  0x30   : > { %431 = shalt.err (!%p428_p8)
}
  0x31   : > { %348 = dma.hbm_to_vmem [thread:$0]  (!%p602_p13), %s149_s14, 128, %s151_s7, %s137_s16  }
  0x32   : > { %159 = sbr.rel (%p626_p2) target bundleno = 73 (0x49), region = 28  ;;  %s649_s23 = sand.u32 (!%p626_p2), 1, %s509_s10  }
  0x33   : > { %s328_s27 = sshll.u32 (!%p626_p2), %s649_s23, 3  ;;  %s162_s28 = scalar_lea.sflag (!%p626_p2), [#allocation3], %s649_s23 }
  0x34   : > { %s165_s30 = scalar_lea.vmem (!%p626_p2), [#allocation2], %s328_s27 }
  0x37   : > { %492 = dma.done.wait (%p577_p6), %s162_s28, 128  }
  0x38   : > { %494 = vsyncadd (%p577_p6), %s162_s28, 4294967168  ;;  %s172_s4 = scalar_lea.sflag [#allocation6], %s649_s23  ;;  %s175_s6 = scalar_lea.vmem [#allocation5], %s328_s27 }
  0x39   : > { %496 = dma.done.wait (%p577_p6), %s172_s4, 128  }
  0x3a   : > { %498 = vsyncadd (%p577_p6), %s172_s4, 4294967168  ;;  %s332_s24 = sshll.u32 %s555_s13, 3  ;;  %v202_v0 = vld [vmem:[%s165_s30] sm:$0xff]  ;;  %v204_v1 = vld [vmem:[%s175_s6] sm:$0xff]  ;;  %s201_s16 = scalar_lea.vmem [#allocation7], %s328_s27 }
  0x3b   : > { %s219_s14 = scalar_lea.hbm %s697_s2, %s332_s24  ;;  %v203_v2 = vadd.f32 1.0, %v202_v0  ;;  %s221_s17 = sshll.u32 %s201_s16, 4  ;;  %s222_s17 = int_to_ptr.vmem [resolvable:$true] %s221_s17 }
  0x3c   : > { %s223_s29 = sshll.u32 %s219_s14, 4  ;;  %s209_s20 = scalar_lea.sflag [#allocation4], %s649_s23  ;;  %s224_s29 = int_to_ptr.hbm [resolvable:$true] %s223_s29 }
  0x3d   : > { %v205_v3 = vmul.f32 %v204_v1, %v203_v2  ;;  %s461_s3 = sshra.s32 %s224_s29, 4  ;;  %s467_s26 = scalar_lea.hbm %s697_s2, 16  ;;  %s462_s3 = int_to_ptr.hbm [resolvable:$true] %s461_s3 }
  0x3e   : > { %s463_s13 = scalar_lea.hbm %s462_s3, 8  ;;  %p468_p10 = scmp.lt.s32.totalorder %s462_s3, %s697_s2 }
  0x3f   : > { %v206_v4 = vmax.f32 %v205_v3, 0.0  ;;  %p464_p6 = scmp.ne.s32.totalorder %s462_s3, %s463_s13  ;;  %p469_p2 = scmp.lt.s32.totalorder %s467_s26, %s463_s13 }
  0x41   : > { %207 = vst [vmem:[%s201_s16] sm:$0xff] %v206_v4  ;;  %p465_p13 = pnand %p464_p6, %p584_p11  ;;  %p470_p9 = por %p469_p2, %p468_p10 }
  0x43   : > { %p466_p3 = pneg %p465_p13 }
  0x45   : > { %p471_p0 = pnand %p470_p9, %p466_p3 }
  0x47   : > { %474 = shalt.err (!%p471_p0)
}
  0x48   : > { %340 = dma.vmem_to_hbm [thread:$0]  (%p584_p11), %s222_s17, 128, %s224_s29, %s209_s20  }
  0x49 PF: > { %s235_s23 = sand.u32 1, %s505_s9   ;;  %p704_p1 = scmp.ge.s32.totalorder %s517_s12, 2 }
  0x4a   : > { %s236_s28 = scalar_lea.sflag [#allocation4], %s235_s23 }
  0x4b   : > { %p350_p4 = pnand %p704_p1, %p588_p12 }
  0x4d   : > { %p351_p7 = pneg %p350_p4 }
  0x4f   : > { %500 = dma.done.wait (%p351_p7), %s236_s28, 128  }
  0x50   : > { %502 = vsyncadd (%p351_p7), %s236_s28, 4294967168  ;;  %p18_p5 = scmp.ge.s32.totalorder %s559_s15, 4   ;;  %s705_s9 = smov %s509_s10 }
  0x51   : > { %s706_s10 = smov %s513_s11  ;;  %s707_s11 = smov %s571_s18 }
  0x52   : > { %s708_s12 = smov %s559_s15  ;;  %20 = sbr.rel (!%p18_p5) target bundleno = 7 (0x7), region = 86 }
  0x57   :  { %242 = vsyncpa [#allocation3], 1 }
  0x58   :  { %244 = vsyncpa [#allocation3 + $0x1], 1 }
  0x59   :  { %245 = vsyncpa [#allocation6], 1 }
  0x5a   :  { %247 = vsyncpa [#allocation6 + $0x1], 1 }
  0x5b   :  { %248 = vsyncpa [#allocation4], 1 }
  0x5c   :  { %250 = vsyncpa [#allocation4 + $0x1], 1 }

</bundles_post_ra>
